<compile_context>
chip_gen: v7x
topology: tpu7x:2x2x1
jax: 0.10.0
libtpu: 0.0.40
codegen_flags: <defaults>
</compile_context>

<pallas_src>
import functools
import math

import jax
import jax.numpy as jnp
from jax.experimental import pallas as pl
from jax.experimental.pallas import tpu as pltpu

EPS = 1e-5                       # nn.LayerNorm default eps
MXU_DTYPE = jnp.bfloat16         # matmul operand dtype (f32 accumulation)


def _round_up(x, m):
    return ((x + m - 1) // m) * m


def _pick_row_block(rows, block_rows):
    """Sublane-legal (multiple of 8) row tile, large to amortize per-step cost."""
    br = min(block_rows, _round_up(rows, 8))
    br = max(8, (br // 8) * 8)
    rows_pad = _round_up(rows, br)
    return br, rows_pad


@functools.lru_cache(maxsize=None)
def _physical_vmem_bytes():
    try:
        info = pltpu.get_tpu_info()
        for name in ("vmem_capacity_bytes", "vmem_size_bytes", "vmem_bytes"):
            v = getattr(info, name, None)
            if v:
                return int(v)
    except Exception:
        pass
    return 64 << 20   # conservative (v7x per-core VMEM)


def _vmem_limit(block_bytes):
    # ~75% of physical VMEM: ~96 MiB on v5e/v6e (128 MiB), ~48 MiB on v7x (64 MiB).
    cap = int(_physical_vmem_bytes() * 3 // 4)
    want = max(32 << 20, 4 * int(block_bytes))
    return int(min(cap, want))


# ----------------------------------------------------------------------------
# Fused (optional LayerNorm) -> matmul + bias (+ReLU) (+residual) kernel
# ----------------------------------------------------------------------------
def _ln_linear_kernel(*refs, do_ln, activation, has_residual):
    it = iter(refs)
    x_ref = next(it)
    if do_ln:
        g_ref = next(it)
        bl_ref = next(it)
    w_ref = next(it)
    b_ref = next(it)
    r_ref = next(it) if has_residual else None
    o_ref = next(it)

    x = x_ref[...].astype(jnp.float32)                       # (bm, K)
    if do_ln:
        mean = jnp.mean(x, axis=-1, keepdims=True)
        xc = x - mean
        var = jnp.mean(xc * xc, axis=-1, keepdims=True)      # two-pass variance
        x = xc * jax.lax.rsqrt(var + EPS)                    # EUP
        x = x * g_ref[...].astype(jnp.float32) + bl_ref[...].astype(jnp.float32)

    acc = jnp.dot(x.astype(MXU_DTYPE), w_ref[...].astype(MXU_DTYPE),
                  preferred_element_type=jnp.float32)        # (bm, bn) f32
    acc = acc + b_ref[...].astype(jnp.float32)
    if activation == "relu":
        acc = jnp.maximum(acc, 0.0)
    if has_residual:
        acc = acc + r_ref[...].astype(jnp.float32)
    o_ref[...] = acc.astype(o_ref.dtype)


def fused_linear_pallas(x, w, b, *, gamma=None, beta=None, activation=None,
                        residual=None, block_rows=512, block_cols=512):
    """y = activation(LN(x) @ w + b) [+ residual]; LN/activation/residual optional."""
    orig_shape = x.shape
    K = orig_shape[-1]
    N = w.shape[1]
    do_ln = gamma is not None
    has_res = residual is not None

    x2 = x.reshape(-1, K)
    rows = x2.shape[0]
    bm, rows_pad = _pick_row_block(rows, block_rows)
    pad_rows = rows_pad - rows
    if pad_rows:
        x2 = jnp.pad(x2, ((0, pad_rows), (0, 0)))

    # lane tile: full N when modest (legal as "full dim"), else 128-multiple tiles
    if N <= max(block_cols, 512):
        bn, n_pad = N, N
        w2, b2 = w, b
    else:
        bn = block_cols
        n_pad = _round_up(N, bn)
        w2 = jnp.pad(w, ((0, 0), (0, n_pad - N)))
        b2 = jnp.pad(b, ((0, n_pad - N),))
    b2 = b2.reshape(1, n_pad).astype(jnp.float32)

    operands = [x2]
    in_specs = [pl.BlockSpec((bm, K), lambda j, i: (i, 0))]
    if do_ln:
        operands += [gamma.reshape(1, K).astype(jnp.float32),
                     beta.reshape(1, K).astype(jnp.float32)]
        in_specs += [pl.BlockSpec((1, K), lambda j, i: (0, 0)),
                     pl.BlockSpec((1, K), lambda j, i: (0, 0))]
    operands += [w2, b2]
    in_specs += [pl.BlockSpec((K, bn), lambda j, i: (0, j)),   # resident across i
                 pl.BlockSpec((1, bn), lambda j, i: (0, j))]
    if has_res:
        r2 = residual.reshape(-1, N)
        if pad_rows or n_pad != N:
            r2 = jnp.pad(r2, ((0, pad_rows), (0, n_pad - N)))
        operands.append(r2)
        in_specs.append(pl.BlockSpec((bm, bn), lambda j, i: (i, j)))

    wbytes = jnp.dtype(w2.dtype).itemsize
    block_bytes = (2 * bm * K * 4 + 2 * K * bn * wbytes + 2 * bn * 4
                   + 2 * bm * bn * 4 + (2 * bm * bn * 4 if has_res else 0)
                   + 4 * K * 4)

    out = pl.pallas_call(
        functools.partial(_ln_linear_kernel, do_ln=do_ln,
                          activation=activation, has_residual=has_res),
        out_shape=jax.ShapeDtypeStruct((rows_pad, n_pad), x.dtype),
        grid_spec=pltpu.PrefetchScalarGridSpec(
            num_scalar_prefetch=0,
            # N-tiles outermost -> weight tile stays resident across row tiles.
            grid=(n_pad // bn, rows_pad // bm),
            in_specs=in_specs,
            out_specs=pl.BlockSpec((bm, bn), lambda j, i: (i, j)),
        ),
        compiler_params=pltpu.CompilerParams(
            dimension_semantics=("parallel", "parallel"),
            vmem_limit_bytes=_vmem_limit(block_bytes),
        ),
    )(*operands)

    if pad_rows or n_pad != N:
        out = out[:rows, :N]
    return out.reshape(orig_shape[:-1] + (N,))


# ----------------------------------------------------------------------------
# Attention score kernel: softmax(q @ k^T / sqrt(dh)) for all heads of a batch
# element in one grid step (inputs already projected, concatenated [q | k]).
# ----------------------------------------------------------------------------
def _attn_scores_kernel(qk_ref, o_ref, *, heads, d_head, d_model, scale):
    qk = qk_ref[0].astype(jnp.float32)           # (S, 2D)
    q = qk[:, :d_model]
    k = qk[:, d_model:]
    for h in range(heads):
        qh = q[:, h * d_head:(h + 1) * d_head].astype(MXU_DTYPE)
        kh = k[:, h * d_head:(h + 1) * d_head].astype(MXU_DTYPE)
        s = jax.lax.dot_general(qh, kh, (((1,), (1,)), ((), ())),
                                preferred_element_type=jnp.float32) * scale
        m = jnp.max(s, axis=-1, keepdims=True)
        e = jnp.exp(s - m)
        denom = jnp.sum(e, axis=-1, keepdims=True)
        p = e * pl.reciprocal(denom, approx=True)           # EUP slot
        o_ref[0, h] = p.astype(o_ref.dtype)


def attention_scores_pallas(qk, heads, d_head):
    """qk: (B, S, 2D) concatenated q/k projections -> (B, H, S, S) probs."""
    B, S, twoD = qk.shape
    d_model = heads * d_head
    scale = 1.0 / math.sqrt(d_head)
    sb = jnp.dtype(MXU_DTYPE).itemsize
    block_bytes = 2 * S * twoD * 4 + 2 * heads * S * S * sb + 2 * S * S * 4
    return pl.pallas_call(
        functools.partial(_attn_scores_kernel, heads=heads, d_head=d_head,
                          d_model=d_model, scale=scale),
        out_shape=jax.ShapeDtypeStruct((B, heads, S, S), MXU_DTYPE),
        grid_spec=pltpu.PrefetchScalarGridSpec(
            num_scalar_prefetch=0,
            grid=(B,),
            in_specs=[pl.BlockSpec((1, S, twoD), lambda b: (b, 0, 0))],
            out_specs=pl.BlockSpec((1, heads, S, S), lambda b: (b, 0, 0, 0)),
        ),
        compiler_params=pltpu.CompilerParams(
            dimension_semantics=("parallel",),
            vmem_limit_bytes=_vmem_limit(block_bytes),
        ),
    )(qk)


# ----------------------------------------------------------------------------
# Attention branch kernel (per batch element, all heads):
#   out = im + Wo @ concat_h( scores_h @ (LN1(q) @ Wv + bv)_h ) + bo
# Fuses: LayerNorm, V projection, attention apply, head merge, output
# projection and the residual add.
# ----------------------------------------------------------------------------
def _attn_branch_kernel(q_ref, im_ref, s_ref, g_ref, bl_ref, wv_ref, bv_ref,
                        wo_ref, bo_ref, o_ref, *, heads, d_head):
    x = q_ref[0].astype(jnp.float32)                       # (S, D)
    mean = jnp.mean(x, axis=-1, keepdims=True)
    xc = x - mean
    var = jnp.mean(xc * xc, axis=-1, keepdims=True)
    xn = xc * jax.lax.rsqrt(var + EPS)
    xn = xn * g_ref[...].astype(jnp.float32) + bl_ref[...].astype(jnp.float32)

    v = jnp.dot(xn.astype(MXU_DTYPE), wv_ref[...].astype(MXU_DTYPE),
                preferred_element_type=jnp.float32)
    v = v + bv_ref[...].astype(jnp.float32)                # (S, D)

    head_outs = []
    for h in range(heads):
        p = s_ref[0, h].astype(MXU_DTYPE)                  # (S, S)
        vh = v[:, h * d_head:(h + 1) * d_head].astype(MXU_DTYPE)
        head_outs.append(jnp.dot(p, vh, preferred_element_type=jnp.float32))
    concat = jnp.concatenate(head_outs, axis=-1)           # (S, D)

    out = jnp.dot(concat.astype(MXU_DTYPE), wo_ref[...].astype(MXU_DTYPE),
                  preferred_element_type=jnp.float32)
    out = out + bo_ref[...].astype(jnp.float32)
    o_ref[0] = (im_ref[0].astype(jnp.float32) + out).astype(o_ref.dtype)


def attention_branch_pallas(q_cur, im, scores, gamma, beta, wv, bv, wo, bo,
                            heads, d_head):
    B, S, D = q_cur.shape
    wb = jnp.dtype(wv.dtype).itemsize
    sb = jnp.dtype(scores.dtype).itemsize
    block_bytes = (3 * 2 * S * D * 4 + 2 * heads * S * S * sb
                   + 2 * 2 * D * D * wb + 8 * D * 4)
    return pl.pallas_call(
        functools.partial(_attn_branch_kernel, heads=heads, d_head=d_head),
        out_shape=jax.ShapeDtypeStruct((B, S, D), q_cur.dtype),
        grid_spec=pltpu.PrefetchScalarGridSpec(
            num_scalar_prefetch=0,
            grid=(B,),
            in_specs=[
                pl.BlockSpec((1, S, D), lambda b: (b, 0, 0)),           # q (LN1 -> V)
                pl.BlockSpec((1, S, D), lambda b: (b, 0, 0)),           # im residual
                pl.BlockSpec((1, heads, S, S), lambda b: (b, 0, 0, 0)), # scores
                pl.BlockSpec((1, D), lambda b: (0, 0)),                 # gamma1
                pl.BlockSpec((1, D), lambda b: (0, 0)),                 # beta1
                pl.BlockSpec((D, D), lambda b: (0, 0)),                 # Wv (resident)
                pl.BlockSpec((1, D), lambda b: (0, 0)),                 # bv
                pl.BlockSpec((D, D), lambda b: (0, 0)),                 # Wo (resident)
                pl.BlockSpec((1, D), lambda b: (0, 0)),                 # bo
            ],
            out_specs=pl.BlockSpec((1, S, D), lambda b: (b, 0, 0)),
        ),
        compiler_params=pltpu.CompilerParams(
            dimension_semantics=("parallel",),
            vmem_limit_bytes=_vmem_limit(block_bytes),
        ),
    )(q_cur, im, scores,
      gamma.reshape(1, D).astype(jnp.float32),
      beta.reshape(1, D).astype(jnp.float32),
      wv, bv.reshape(1, D).astype(jnp.float32),
      wo, bo.reshape(1, D).astype(jnp.float32))


# ----------------------------------------------------------------------------
# Parameter init (matches nn.Linear / nn.LayerNorm defaults)
# ----------------------------------------------------------------------------
def _init_params(key, d_model, heads):
    d_ff = d_model * 2
    ks = jax.random.split(key, 12)

    def lin_init(kw, kb, fan_in, fan_out):
        bound = 1.0 / math.sqrt(fan_in)
        w = jax.random.uniform(kw, (fan_in, fan_out), jnp.float32, -bound, bound)
        b = jax.random.uniform(kb, (fan_out,), jnp.float32, -bound, bound)
        return w, b

    wq, bq = lin_init(ks[0], ks[1], d_model, d_model)
    wk, bk = lin_init(ks[2], ks[3], d_model, d_model)
    wv, bv = lin_init(ks[4], ks[5], d_model, d_model)
    wo, bo = lin_init(ks[6], ks[7], d_model, d_model)
    w1, b1 = lin_init(ks[8], ks[9], d_model, d_ff)
    w2, b2 = lin_init(ks[10], ks[11], d_ff, d_model)
    return dict(
        wq=wq, bq=bq, wk=wk, bk=bk, wv=wv, bv=bv, wo=wo, bo=bo,
        w1=w1, b1=b1, w2=w2, b2=b2,
        g1=jnp.ones((d_model,), jnp.float32), be1=jnp.zeros((d_model,), jnp.float32),
        g2=jnp.ones((d_model,), jnp.float32), be2=jnp.zeros((d_model,), jnp.float32),
    )


class CRFTransPallas:
    """JAX/Pallas equivalent of the PyTorch CRFTrans module (eval-mode forward)."""

    def __init__(self, d_model, heads, nite=3, key=None):
        assert d_model % heads == 0
        self.d_model = d_model
        self.h = heads
        self.d_head = d_model // heads
        self.nite = nite
        if key is None:
            key = jax.random.PRNGKey(0)
        self.params = _init_params(key, d_model, heads)   # f32 master copy
        p = self.params
        wd = MXU_DTYPE
        # Kernel-side params: matmul weights pre-cast to bf16 (halves weight DMA),
        # Q/K projection fused into a single (D, 2D) weight.
        self.kp = dict(
            w_qk=jnp.concatenate([p["wq"], p["wk"]], axis=1).astype(wd),
            b_qk=jnp.concatenate([p["bq"], p["bk"]]),
            wv=p["wv"].astype(wd), bv=p["bv"],
            wo=p["wo"].astype(wd), bo=p["bo"],
            w1=p["w1"].astype(wd), b1=p["b1"],
            w2=p["w2"].astype(wd), b2=p["b2"],
            g1=p["g1"], be1=p["be1"], g2=p["g2"], be2=p["be2"],
        )

    def __call__(self, im, pos=None):
        kp = self.kp
        if pos is not None:
            im = im + pos

        # Loop-invariant precompute: `im` is fixed inside the nite-loop, so
        # norm_1(im), its Q/K projections and the softmax score matrix are the
        # same every iteration (dropout is identity in eval mode).
        qk = fused_linear_pallas(im, kp["w_qk"], kp["b_qk"],
                                 gamma=kp["g1"], beta=kp["be1"])      # (B,S,2D)
        scores = attention_scores_pallas(qk, self.h, self.d_head)     # (B,H,S,S)

        q = im
        for _ in range(self.nite):
            # q = im + Wo·Attn(scores, Wv·LN1(q)+bv) + bo    (dropout_1: identity)
            q = attention_branch_pallas(q, im, scores, kp["g1"], kp["be1"],
                                        kp["wv"], kp["bv"], kp["wo"], kp["bo"],
                                        self.h, self.d_head)
            # q = q + W2·relu(W1·LN2(q)+b1) + b2             (dropout_2: identity)
            h = fused_linear_pallas(q, kp["w1"], kp["b1"],
                                    gamma=kp["g2"], beta=kp["be2"],
                                    activation="relu")
            q = fused_linear_pallas(h, kp["w2"], kp["b2"], residual=q)
        return q


# ----------------------------------------------------------------------------
# Pure-JAX reference (same params, literal per-iteration recompute) for checking
# ----------------------------------------------------------------------------
def _reference_forward(params, im, heads, nite, pos=None):
    hi = jax.lax.Precision.HIGHEST

    def ln(x, g, b):
        mean = jnp.mean(x, axis=-1, keepdims=True)
        var = jnp.mean((x - mean) ** 2, axis=-1, keepdims=True)
        return (x - mean) / jnp.sqrt(var + EPS) * g + b

    def lin(x, w, b):
        return jnp.matmul(x, w, precision=hi) + b

    def mha(xq, xk, xv):
        B, S, D = xq.shape
        dh = D // heads
        q = lin(xq, params["wq"], params["bq"]).reshape(B, S, heads, dh).transpose(0, 2, 1, 3)
        k = lin(xk, params["wk"], params["bk"]).reshape(B, S, heads, dh).transpose(0, 2, 1, 3)
        v = lin(xv, params["wv"], params["bv"]).reshape(B, S, heads, dh).transpose(0, 2, 1, 3)
        scores = jnp.einsum("bhqd,bhkd->bhqk", q, k, precision=hi) / math.sqrt(dh)
        scores = jax.nn.softmax(scores, axis=-1)
        o = jnp.einsum("bhqk,bhkd->bhqd", scores, v, precision=hi)
        o = o.transpose(0, 2, 1, 3).reshape(B, S, D)
        return lin(o, params["wo"], params["bo"])

    def ff(x):
        return lin(jax.nn.relu(lin(x, params["w1"], params["b1"])),
                   params["w2"], params["b2"])

    if pos is not None:
        im = im + pos
    q = im
    for _ in range(nite):
        n_im = ln(im, params["g1"], params["be1"])
        n_q = ln(q, params["g1"], params["be1"])
        q = im + mha(n_im, n_im, n_q)
        q = q + ff(ln(q, params["g2"], params["be2"]))
    return q


if __name__ == "__main__":
    batch, seq, d_model, heads, nite = 2, 8, 32, 4, 3
    key = jax.random.PRNGKey(0)
    k_x, k_pos, k_params = jax.random.split(key, 3)
    x = jax.random.normal(k_x, (batch, seq, d_model), dtype=jnp.float32)
    pos = 0.1 * jax.random.normal(k_pos, (batch, seq, d_model), dtype=jnp.float32)

    model = CRFTransPallas(d_model, heads, nite=nite, key=k_params)
    y = model(x, pos)
    y = jax.block_until_ready(y)
    assert y.shape == x.shape

    ref = _reference_forward(model.params, x, heads, nite, pos=pos)
    err = float(jnp.max(jnp.abs(y - ref)))
    scale = float(jnp.max(jnp.abs(ref))) + 1e-6
    rel = err / scale
    # bf16 MXU operands (f32 accumulation) across nite=3 residual iterations
    # give a few-1e-3 relative error; 2e-2 keeps comfortable margin.
    assert rel < 2e-2, f"relative error too large: {rel}"
    print("KERNEL_OK")
</pallas_src>

<mosaic_0001>
module attributes {stable_mosaic.version = 11 : i64} {
  func.func @_ln_linear_kernel(%arg0: i32, %arg1: i32, %arg2: memref<16x32xf32, #tpu.memory_space<vmem>>, %arg3: memref<1x32xf32, #tpu.memory_space<vmem>>, %arg4: memref<1x32xf32, #tpu.memory_space<vmem>>, %arg5: memref<32x64xbf16, #tpu.memory_space<vmem>>, %arg6: memref<1x64xf32, #tpu.memory_space<vmem>>, %arg7: memref<16x64xf32, #tpu.memory_space<vmem>>) attributes {dimension_semantics = [#tpu.dimension_semantics<parallel>, #tpu.dimension_semantics<parallel>], iteration_bounds = array<i64: 1, 1>, scalar_prefetch = 0 : i64, scratch_operands = 0 : i64, tpu.core_type = #tpu.core_type<tc>, window_params = [{transform_indices = @transform_0, window_bounds = array<i64: 16, 32>}, {pipeline_mode = #tpu.pipeline_mode<synchronous>, transform_indices = @transform_1, window_bounds = array<i64: 1, 32>}, {pipeline_mode = #tpu.pipeline_mode<synchronous>, transform_indices = @transform_2, window_bounds = array<i64: 1, 32>}, {transform_indices = @transform_3, window_bounds = array<i64: 32, 64>}, {transform_indices = @transform_4, window_bounds = array<i64: 1, 64>}, {transform_indices = @transform_5, window_bounds = array<i64: 16, 64>}]} {
    %c0 = arith.constant 0 : index
    %c0_0 = arith.constant 0 : index
    %0 = vector.load %arg2[%c0, %c0_0] : memref<16x32xf32, #tpu.memory_space<vmem>>, vector<16x32xf32>
    %cst = arith.constant dense<0.000000e+00> : vector<16xf32>
    %1 = vector.multi_reduction <add>, %0, %cst [1] : vector<16x32xf32> to vector<16xf32>
    %2 = vector.shape_cast %1 : vector<16xf32> to vector<16x1xf32>
    %cst_1 = arith.constant 3.200000e+01 : f32
    %3 = vector.broadcast %cst_1 : f32 to vector<16x1xf32>
    %4 = arith.divf %2, %3 : vector<16x1xf32>
    %5 = vector.broadcast %4 : vector<16x1xf32> to vector<16x32xf32>
    %6 = arith.subf %0, %5 : vector<16x32xf32>
    %7 = arith.mulf %6, %6 : vector<16x32xf32>
    %cst_2 = arith.constant dense<0.000000e+00> : vector<16xf32>
    %8 = vector.multi_reduction <add>, %7, %cst_2 [1] : vector<16x32xf32> to vector<16xf32>
    %9 = vector.shape_cast %8 : vector<16xf32> to vector<16x1xf32>
    %cst_3 = arith.constant 3.200000e+01 : f32
    %10 = vector.broadcast %cst_3 : f32 to vector<16x1xf32>
    %11 = arith.divf %9, %10 : vector<16x1xf32>
    %cst_4 = arith.constant 9.99999974E-6 : f32
    %12 = vector.broadcast %cst_4 : f32 to vector<16x1xf32>
    %13 = arith.addf %11, %12 : vector<16x1xf32>
    %14 = math.rsqrt %13 : vector<16x1xf32>
    %15 = vector.broadcast %14 : vector<16x1xf32> to vector<16x32xf32>
    %16 = arith.mulf %6, %15 : vector<16x32xf32>
    %c0_5 = arith.constant 0 : index
    %c0_6 = arith.constant 0 : index
    %17 = vector.load %arg3[%c0_5, %c0_6] : memref<1x32xf32, #tpu.memory_space<vmem>>, vector<1x32xf32>
    %18 = vector.broadcast %17 : vector<1x32xf32> to vector<16x32xf32>
    %19 = arith.mulf %16, %18 : vector<16x32xf32>
    %c0_7 = arith.constant 0 : index
    %c0_8 = arith.constant 0 : index
    %20 = vector.load %arg4[%c0_7, %c0_8] : memref<1x32xf32, #tpu.memory_space<vmem>>, vector<1x32xf32>
    %21 = vector.broadcast %20 : vector<1x32xf32> to vector<16x32xf32>
    %22 = arith.addf %19, %21 : vector<16x32xf32>
    %23 = arith.truncf %22 : vector<16x32xf32> to vector<16x32xbf16>
    %c0_9 = arith.constant 0 : index
    %c0_10 = arith.constant 0 : index
    %24 = vector.load %arg5[%c0_9, %c0_10] : memref<32x64xbf16, #tpu.memory_space<vmem>>, vector<32x64xbf16>
    %cst_11 = arith.constant dense<0.000000e+00> : vector<16x64xf32>
    %25 = tpu.matmul %23, %24, %cst_11 {dimension_numbers = #tpu.dot_dimension_numbers<[1], [0], [0], [1], [0, 0, 1, 1], [], []>} : vector<16x32xbf16>, vector<32x64xbf16>, vector<16x64xf32> -> vector<16x64xf32>
    %c0_12 = arith.constant 0 : index
    %c0_13 = arith.constant 0 : index
    %26 = vector.load %arg6[%c0_12, %c0_13] : memref<1x64xf32, #tpu.memory_space<vmem>>, vector<1x64xf32>
    %27 = vector.broadcast %26 : vector<1x64xf32> to vector<16x64xf32>
    %28 = arith.addf %25, %27 : vector<16x64xf32>
    %c0_14 = arith.constant 0 : index
    %c0_15 = arith.constant 0 : index
    %29 = vector.load %arg7[%c0_14, %c0_15] : memref<16x64xf32, #tpu.memory_space<vmem>>, vector<16x64xf32>
    tpu.vector_store %arg7[%c0_14, %c0_15], %28 {strides = array<i32>} : memref<16x64xf32, #tpu.memory_space<vmem>>, vector<16x64xf32>,
    return
  }
  func.func @transform_0(%arg0: i32, %arg1: i32) -> (i32, i32) {
    %c0_i32 = arith.constant 0 : i32
    %c0_i32_0 = arith.constant 0 : i32
    return %arg1, %c0_i32 : i32, i32
  }
  func.func @transform_1(%arg0: i32, %arg1: i32) -> (i32, i32) {
    %c0_i32 = arith.constant 0 : i32
    %c0_i32_0 = arith.constant 0 : i32
    %c0_i32_1 = arith.constant 0 : i32
    return %c0_i32, %c0_i32_0 : i32, i32
  }
  func.func @transform_2(%arg0: i32, %arg1: i32) -> (i32, i32) {
    %c0_i32 = arith.constant 0 : i32
    %c0_i32_0 = arith.constant 0 : i32
    %c0_i32_1 = arith.constant 0 : i32
    return %c0_i32, %c0_i32_0 : i32, i32
  }
  func.func @transform_3(%arg0: i32, %arg1: i32) -> (i32, i32) {
    %c0_i32 = arith.constant 0 : i32
    %c0_i32_0 = arith.constant 0 : i32
    return %c0_i32, %arg0 : i32, i32
  }
  func.func @transform_4(%arg0: i32, %arg1: i32) -> (i32, i32) {
    %c0_i32 = arith.constant 0 : i32
    %c0_i32_0 = arith.constant 0 : i32
    return %c0_i32, %arg0 : i32, i32
  }
  func.func @transform_5(%arg0: i32, %arg1: i32) -> (i32, i32) {
    %c0_i32 = arith.constant 0 : i32
    return %arg1, %arg0 : i32, i32
  }
}

</mosaic_0001>

<bundles_post_ra>
// kernel: tpu_custom_call.1
= control target key start
LH: loop header
LB: loop body
LE: loop exit
PB: predicated region body
PF: predicated region fallthrough
CT: control target
= control target key end

     0   :  { %10 = vsyncpa [#allocation3], 0  ;;  %s386_s0 = inlined_call_operand.hbm [shape: f32[16,32], index: 0, kind: input, shape index: {}]   ;;  %s387_s1 = inlined_call_operand.vmem [shape: f32[1,32], index: 1, kind: input, shape index: {}]   ;;  %s388_s2 = inlined_call_operand.vmem [shape: f32[1,32], index: 2, kind: input, shape index: {}]   ;;  %s389_s3 = inlined_call_operand.hbm [shape: bf16[32,64], index: 3, kind: input, shape index: {}]   ;;  %s390_s4 = inlined_call_operand.vmem [shape: f32[1,64], index: 4, kind: input, shape index: {}]   ;;  %s391_s5 = inlined_call_operand.hbm [shape: f32[16,64], index: 5, kind: output, shape index: {}]  }
   0x1   :  { %11 = vsyncpa [#allocation6], 0 }
   0x2   :  { %12 = vsyncpa [#allocation4], 0  ;;  %s291_s18 = smov [#allocation2]   ;;  %s219_s22 = scalar_lea.hbm %s386_s0, 256 }
   0x3   :  { %s18_s19 = sshll.u32 %s291_s18, 4  ;;  %p220_p0 = scmp.ne.s32.totalorder %s386_s0, %s219_s22  ;;  %s19_s19 = int_to_ptr.vmem [resolvable:$true] %s18_s19 }
   0x4   :  { %p223_p1 = scmp.lt.u32.totalorder %s219_s22, %s386_s0 }
   0x6   :  { %p225_p2 = pnand %p223_p1, %p220_p0 }
   0x8   :  { %228 = shalt.err (!%p225_p2)
}
   0x9   :  { %s229_s27 = scalar_lea.vmem %s19_s19, 256  ;;  %p234_p4 = scmp.lt.s32.totalorder %s19_s19, %s19_s19 }
   0xa   :  { %p230_p3 = scmp.ne.s32.totalorder %s19_s19, %s229_s27  ;;  %p235_p5 = scmp.lt.s32.totalorder %s229_s27, %s229_s27 }
   0xc   :  { %p236_p6 = por %p235_p5, %p234_p4 }
   0xe   :  { %p237_p7 = pnand %p236_p6, %p230_p3 }
  0x10   :  { %240 = shalt.err (!%p237_p7)
}
  0x11   :  { %s292_s28 = smov 128   ;;  %s293_s29 = smov 8  }
  0x12   :  { %24 = dma.hbm_to_vmem [thread:$0]  %s386_s0, 256, %s19_s19, [#allocation3], %s292_s28, %s292_s28, %s293_s29  }
  0x13   :  { %s294_s7 = smov [#allocation5]   ;;  %s241_s11 = scalar_lea.hbm %s389_s3, 256 }
  0x14   :  { %s34_s8 = sshll.u32 %s294_s7, 4  ;;  %p242_p8 = scmp.ne.s32.totalorder %s389_s3, %s241_s11  ;;  %s35_s8 = int_to_ptr.vmem [resolvable:$true] %s34_s8 }
  0x15   :  { %p245_p9 = scmp.lt.u32.totalorder %s241_s11, %s389_s3 }
  0x17   :  { %p247_p10 = pnand %p245_p9, %p242_p8 }
  0x19   :  { %250 = shalt.err (!%p247_p10)
}
  0x1a   :  { %s251_s16 = scalar_lea.vmem %s35_s8, 256  ;;  %p256_p12 = scmp.lt.s32.totalorder %s35_s8, %s35_s8 }
  0x1b   :  { %p252_p11 = scmp.ne.s32.totalorder %s35_s8, %s251_s16  ;;  %p257_p13 = scmp.lt.s32.totalorder %s251_s16, %s251_s16 }
  0x1d   :  { %p258_p0 = por %p257_p13, %p256_p12 }
  0x1f   :  { %p259_p1 = pnand %p258_p0, %p252_p11 }
  0x21   :  { %262 = shalt.err (!%p259_p1)
}
  0x22   :  { %s295_s0 = smov 64   ;;  %s296_s17 = smov 4  }
  0x23   :  { %40 = dma.hbm_to_vmem [thread:$0]  %s389_s3, 256, %s35_s8, [#allocation6], %s295_s0, %s295_s0, %s296_s17  }
  0x24   :  { %285 = dma.done.wait [#allocation3], 256  }
  0x25   :  { %286 = vsyncadd [#allocation3], 4294967040 }
  0x26   :  { %287 = dma.done.wait [#allocation6], 256  }
  0x27   :  { %288 = vsyncadd [#allocation6], 4294967040  ;;  %vm52_vm0 = vcmask 261120   ;;  %v50_v0 = vld [vmem:[#allocation2] sm:$0xff]  ;;  %v51_v1 = vld [vmem:[#allocation2 + $0x8] sm:$0xff]  ;;  %v297_v15 = vmov 0.0  }
  0x28   :  { %v53_v2 = vsel %vm52_vm0, %v50_v0, 0.0  ;;  %v56_v3 = vsel %vm52_vm0, %v51_v1, 0.0  ;;  %v213_v14 = vld [vmem:[#allocation5] sm:$0xff]   ;;  %196 = vmatprep.subr.bf16.mxu0 %v297_v15  ;;  %v214_v16 = vld [vmem:[#allocation5 + $0x8] sm:$0xff]   ;;  %vm298_vm1 = vmmov 0   ;;  %vm166_vm2 = vcmask 523264  }
  0x29   :  { %54 = vadd.xlane.f32.xlu0 %v53_v2  ;;  %197 = vmatpush3.bf16.msra.mxu0 %v213_v14  ;;  %v187_v25 = vld [vmem:[%s387_s1] ss:$0 sm:$0xff]  ;;  %s299_s1 = smov [#allocation7]  }
  0x2a   :  { %200 = vmatprep.mubr.msk.bf16.mxu0 %vm298_vm1, %v297_v15  ;;  %198 = vmatprep.subr.bf16.mxu0 %v297_v15  ;;  %v188_v29 = vld [vmem:[%s388_s2] ss:$0 sm:$0xff]  ;;  %s174_s25 = sshll.u32 %s299_s1, 4  ;;  %s175_s25 = int_to_ptr.vmem [resolvable:$true] %s174_s25 }
  0x2b   :  { %v189_v34 = vld [vmem:[%s390_s4] ss:$0 sm:$0xff]  ;;  %s263_s2 = scalar_lea.vmem %s175_s25, 256  ;;  %p268_p3 = scmp.lt.s32.totalorder %s175_s25, %s175_s25 }
  0x2c   :  { %p264_p2 = scmp.ne.s32.totalorder %s175_s25, %s263_s2  ;;  %p269_p4 = scmp.lt.s32.totalorder %s263_s2, %s263_s2 }
  0x2d   :  { %57 = vadd.xlane.f32.xlu0 %v56_v3  ;;  %199 = vmatpush3.bf16.msra.mxu0 %v214_v16 }
  0x2e   :  { %p270_p5 = por %p269_p4, %p268_p3 }
  0x30   :  { %p271_p6 = pnand %p270_p5, %p264_p2 }
  0xb6   :  { %v55_v4 = vpop.xlane.xlu0 %54 }
  0xb7   :  { %v60_v5 = vmul.f32 0.03125, %v55_v4 }
  0xb9   :  { %v62_v6 = vsub.f32 %v50_v0, %v60_v5 }
  0xba   :  { %v58_v7 = vpop.xlane.xlu0 %57 }
  0xbb   :  { %v61_v8 = vmul.f32 0.03125, %v58_v7  ;;  %v64_v9 = vmul.f32 %v62_v6, %v62_v6 }
  0xbd   :  { %v63_v10 = vsub.f32 %v51_v1, %v61_v8  ;;  %v66_v11 = vsel %vm52_vm0, %v64_v9, 0.0 }
  0xbe   :  { %67 = vadd.xlane.f32.xlu1 %v66_v11 }
  0xbf   :  { %v65_v12 = vmul.f32 %v63_v10, %v63_v10 }
  0xc1   :  { %v69_v13 = vsel %vm52_vm0, %v65_v12, 0.0 }
  0xc2   :  { %70 = vadd.xlane.f32.xlu1 %v69_v13 }
 0x14b   :  { %v68_v17 = vpop.xlane.xlu1 %67 }
 0x14c   :  { %v72_v18 = vmul.f32 0.03125, %v68_v17 }
 0x14e   :  { %v74_v19 = vadd.f32 1e-05, %v72_v18 }
 0x14f   :  { %v71_v20 = vpop.xlane.xlu1 %70 }
 0x150   :  { %215 = vrsqrt.f32 %v74_v19  ;;  %v73_v21 = vmul.f32 0.03125, %v71_v20 }
 0x152   :  { %v75_v22 = vadd.f32 1e-05, %v73_v21 }
 0x154   :  { %217 = vrsqrt.f32 %v75_v22 }
 0x15a   :  { %v216_v23 = vpop.eup %215 }
 0x15b   :  { %v78_v24 = vmul.f32 %v216_v23, %v62_v6 }
 0x15d   :  { %v87_v28 = vmul.f32 %v187_v25, %v78_v24 }
 0x15e   :  { %v218_v26 = vpop.eup %217 }
 0x15f   :  { %v79_v27 = vmul.f32 %v218_v26, %v63_v10  ;;  %v96_v31 = vadd.f32 %v188_v29, %v87_v28 }
 0x161   :  { %v88_v30 = vmul.f32 %v187_v25, %v79_v27 }
 0x163   :  { %v97_v32 = vadd.f32 %v188_v29, %v88_v30 }
 0x165   :  { %v98_v33 = vpack.c.bf16 %v97_v32, %v96_v31 }
 0x167   :  { %201 = vmatmul.mubr.msk.bf16.vlgmr.msra.gmra.mrb[0].mxu0 %vm52_vm0, %v98_v33 }
 0x23a   :  { %v159_v35 = vpop.f32.mrb[0].mxu0 }
 0x23b   :  { %v160_v36 = vadd.f32 %v189_v34, %v159_v35  ;;  %v202_v37 = vpop.f32.mrb[1].mxu0 }
 0x23c   :  { %v162_v38 = vpop.f32.mrb[2].mxu0 }
 0x23d   :  { %v163_v39 = vadd.f32 %v189_v34, %v162_v38  ;;  %v203_v40 = vpop.f32.mrb[3].mxu0  ;;  %167 = vst.msk [vmem:[#allocation7] sm:$0xff] %vm166_vm2, %v160_v36 }
 0x23f   :  { %168 = vst.msk [vmem:[#allocation7 + $0x8] sm:$0xff] %vm166_vm2, %v163_v39 }
 0x240   :  { %274 = shalt.err (!%p271_p6)
}
 0x241   :  { %s275_s27 = scalar_lea.hbm %s391_s5, 256 }
 0x242   :  { %p276_p7 = scmp.ne.s32.totalorder %s391_s5, %s275_s27  ;;  %p279_p8 = scmp.lt.u32.totalorder %s275_s27, %s391_s5 }
 0x244   :  { %p281_p9 = pnand %p279_p8, %p276_p7 }
 0x246   :  { %284 = shalt.err (!%p281_p9)
}
 0x247   :  { %180 = dma.vmem_to_hbm [thread:$0]  %s175_s25, 256, %s391_s5, [#allocation4], %s292_s28, %s292_s28, %s293_s29  }
 0x248   :  { %289 = dma.done.wait [#allocation4], 256  }
 0x249   :  { %290 = vsyncadd [#allocation4], 4294967040 }
 0x24a   :  { %184 = vsyncpa [#allocation3], 1 }
 0x24b   :  { %185 = vsyncpa [#allocation6], 1 }
 0x24c   :  { %186 = vsyncpa [#allocation4], 1 }

</bundles_post_ra>
